<compile_context>
chip_gen: v6e
topology: v6e:2x2x1
jax: 0.10.0
libtpu: 0.0.40
codegen_flags: <defaults>
</compile_context>

<pallas_src>
import functools
import math

import jax
import jax.numpy as jnp
from jax.experimental import pallas as pl
from jax.experimental.pallas import tpu as pltpu

LOG_STD_MAX = 2.0
LOG_STD_MIN = -20.0
ACT_LIMIT = 1.0

LANE = 128
LOG2 = math.log(2.0)
HALF_LOG_2PI = 0.5 * math.log(2.0 * math.pi)


def _round_up(x, m):
    return (x + m - 1) // m * m


def _pad2d(a, rows, cols):
    r, c = a.shape
    return jnp.pad(a, ((0, rows - r), (0, cols - c)))


def _policy_kernel(obs_ref, eps_ref, w_ref, b_ref, out_ref, *, act_dim):
    A = act_dim
    x = obs_ref[...]                                   # (TB, 128)
    eps = eps_ref[...]                                 # (TB, 128), zero beyond lane A-1

    # PlainMLP: Linear -> ReLU -> Linear -> ReLU (final activation).
    h1 = jnp.maximum(
        jnp.dot(x, w_ref[0], preferred_element_type=jnp.float32) + b_ref[0], 0.0)
    h2 = jnp.maximum(
        jnp.dot(h1, w_ref[1], preferred_element_type=jnp.float32) + b_ref[1], 0.0)

    # Fused heads: lanes [0..A-1] = mu, [A..2A-1] = log_std, rest zero.
    heads = jnp.dot(h2, w_ref[2], preferred_element_type=jnp.float32) + b_ref[2]

    mu = heads                                          # only lanes < A are meaningful
    log_std = pltpu.roll(heads, shift=LANE - A, axis=1)  # log_std now at lanes 0..A-1
    log_std = jnp.clip(log_std, LOG_STD_MIN, LOG_STD_MAX)
    std = jnp.exp(log_std)

    # rsample: pi = mu + std * eps (eps ~ N(0,1), zero on padded lanes).
    pi = mu + std * eps

    # Normal(mu, std).log_prob(pi): (pi - mu)/std == eps exactly.
    logp_el = -0.5 * eps * eps - log_std - HALF_LOG_2PI

    # tanh-squash correction: 2*(log2 - pi - softplus(-2*pi)), stable softplus.
    z = -2.0 * pi
    softplus_z = jnp.maximum(z, 0.0) + jnp.log1p(jnp.exp(-jnp.abs(z)))
    corr = 2.0 * (LOG2 - pi - softplus_z)

    lane = jax.lax.broadcasted_iota(jnp.int32, heads.shape, 1)
    valid = lane < A
    logp = jnp.sum(jnp.where(valid, logp_el - corr, 0.0), axis=-1, keepdims=True)

    act = ACT_LIMIT * jnp.tanh(pi)

    # Pack lane-dense output: lanes 0..A-1 = action, lane A = logp.
    packed = jnp.where(valid, act, 0.0)
    packed = jnp.where(lane == A, logp, packed)
    out_ref[...] = packed.astype(out_ref.dtype)


def squashed_gaussian_policy(obs, eps, params, *, tb=512):
    """Forward pass. obs: (B, F) f32, eps: (B, A) f32 standard-normal noise."""
    (w1, b1, w2, b2, wmu, bmu, wls, bls) = params
    B, F = obs.shape
    H1, H2 = w1.shape[1], w2.shape[1]
    A = wmu.shape[1]
    assert F <= LANE and H1 <= LANE and H2 <= LANE, "feature dims must fit 128 lanes"
    assert 2 * A <= LANE and A + 1 <= LANE, "action dim too large for lane packing"

    # Batch tile: multiple of 8 sublanes, large when batch is large.
    tb = min(tb, _round_up(B, 8))
    B_pad = _round_up(B, tb)

    obs_p = jnp.pad(obs.astype(jnp.float32), ((0, B_pad - B), (0, LANE - F)))
    eps_p = jnp.pad(eps.astype(jnp.float32), ((0, B_pad - B), (0, LANE - A)))

    # Fuse mu/log_std heads and pack all params into two lane-dense slabs.
    w_heads = jnp.concatenate([wmu, wls], axis=1)          # (H2, 2A)
    b_heads = jnp.concatenate([bmu, bls], axis=1)          # (1, 2A)
    w_slab = jnp.stack([_pad2d(w1, LANE, LANE),
                        _pad2d(w2, LANE, LANE),
                        _pad2d(w_heads, LANE, LANE)]).astype(jnp.float32)   # (3,128,128)
    b_slab = jnp.stack([_pad2d(b1, 1, LANE),
                        _pad2d(b2, 1, LANE),
                        _pad2d(b_heads, 1, LANE)]).astype(jnp.float32)      # (3,1,128)

    grid = (B_pad // tb,)
    kernel = functools.partial(_policy_kernel, act_dim=A)

    cost = pl.CostEstimate(
        flops=2 * B_pad * LANE * LANE * 3,
        transcendentals=4 * B_pad * LANE,
        bytes_accessed=4 * (obs_p.size + eps_p.size + B_pad * LANE
                            + w_slab.size + b_slab.size),
    )

    out = pl.pallas_call(
        kernel,
        out_shape=jax.ShapeDtypeStruct((B_pad, LANE), jnp.float32),
        grid=grid,
        in_specs=[
            pl.BlockSpec((tb, LANE), lambda i: (i, 0)),            # obs tile
            pl.BlockSpec((tb, LANE), lambda i: (i, 0)),            # eps tile
            pl.BlockSpec((3, LANE, LANE), lambda i: (0, 0, 0)),    # weight slab (resident)
            pl.BlockSpec((3, 1, LANE), lambda i: (0, 0, 0)),       # bias slab (resident)
        ],
        out_specs=pl.BlockSpec((tb, LANE), lambda i: (i, 0)),
        compiler_params=pltpu.CompilerParams(
            dimension_semantics=("parallel",)),                    # v7x: shard across 2 TCs
        cost_estimate=cost,
    )(obs_p, eps_p, w_slab, b_slab)

    return out[:B, :A], out[:B, A:A + 1]


def init_params(key, obs_dim, hidden, act_dim):
    """Deterministic synthetic params, stored as (in, out) for x @ W + b."""
    ks = jax.random.split(key, 8)

    def lin(kw, kb, fan_in, fan_out):
        lim = 1.0 / math.sqrt(fan_in)
        w = jax.random.uniform(kw, (fan_in, fan_out), jnp.float32, -lim, lim)
        b = jax.random.uniform(kb, (1, fan_out), jnp.float32, -lim, lim)
        return w, b

    w1, b1 = lin(ks[0], ks[1], obs_dim, hidden[0])
    w2, b2 = lin(ks[2], ks[3], hidden[0], hidden[1])
    wmu, bmu = lin(ks[4], ks[5], hidden[1], act_dim)
    wls, bls = lin(ks[6], ks[7], hidden[1], act_dim)
    return (w1, b1, w2, b2, wmu, bmu, wls, bls)


def reference(obs, eps, params):
    """Pure-JAX reference matching the PyTorch module semantics."""
    w1, b1, w2, b2, wmu, bmu, wls, bls = params
    h1 = jnp.maximum(obs @ w1 + b1, 0.0)
    h2 = jnp.maximum(h1 @ w2 + b2, 0.0)
    mu = h2 @ wmu + bmu
    log_std = jnp.clip(h2 @ wls + bls, LOG_STD_MIN, LOG_STD_MAX)
    std = jnp.exp(log_std)
    pi = mu + std * eps
    logp = jnp.sum(-0.5 * ((pi - mu) / std) ** 2 - log_std - HALF_LOG_2PI,
                   axis=-1, keepdims=True)
    logp = logp - jnp.sum(2.0 * (LOG2 - pi - jax.nn.softplus(-2.0 * pi)),
                          axis=-1, keepdims=True)
    act = ACT_LIMIT * jnp.tanh(pi)
    return act, logp


if __name__ == "__main__":
    key = jax.random.PRNGKey(0)
    k_obs, k_eps, k_par = jax.random.split(key, 3)

    B, OBS_DIM, ACT_DIM = 8, 32, 8
    HIDDEN = [64, 64]

    obs = jax.random.normal(k_obs, (B, OBS_DIM), dtype=jnp.float32)
    eps = jax.random.normal(k_eps, (B, ACT_DIM), dtype=jnp.float32)
    params = init_params(k_par, OBS_DIM, HIDDEN, ACT_DIM)

    pi_action, logp_pi = squashed_gaussian_policy(obs, eps, params)
    jax.block_until_ready((pi_action, logp_pi))

    assert pi_action.shape == (B, ACT_DIM) and logp_pi.shape == (B, 1)
    assert bool(jnp.all(jnp.isfinite(pi_action))) and bool(jnp.all(jnp.isfinite(logp_pi)))

    ref_act, ref_logp = reference(obs, eps, params)
    assert bool(jnp.allclose(pi_action, ref_act, atol=1e-2, rtol=1e-2)), "action mismatch"
    assert bool(jnp.allclose(logp_pi, ref_logp, atol=1e-2, rtol=1e-2)), "logp mismatch"

    print("KERNEL_OK")
</pallas_src>

<mosaic_0001>
module attributes {stable_mosaic.version = 11 : i64} {
  func.func @_policy_kernel(%arg0: i32, %arg1: memref<8x128xf32, #tpu.memory_space<vmem>>, %arg2: memref<8x128xf32, #tpu.memory_space<vmem>>, %arg3: memref<3x128x128xf32, #tpu.memory_space<vmem>>, %arg4: memref<3x1x128xf32, #tpu.memory_space<vmem>>, %arg5: memref<8x128xf32, #tpu.memory_space<vmem>>) attributes {dimension_semantics = [#tpu.dimension_semantics<parallel>], iteration_bounds = array<i64: 1>, scalar_prefetch = 0 : i64, scratch_operands = 0 : i64, tpu.core_type = #tpu.core_type<tc>, window_params = [{transform_indices = @transform_0, window_bounds = array<i64: 8, 128>}, {transform_indices = @transform_1, window_bounds = array<i64: 8, 128>}, {pipeline_mode = #tpu.pipeline_mode<synchronous>, transform_indices = @transform_2, window_bounds = array<i64: 3, 128, 128>}, {pipeline_mode = #tpu.pipeline_mode<synchronous>, transform_indices = @transform_3, window_bounds = array<i64: 3, 1, 128>}, {transform_indices = @transform_4, window_bounds = array<i64: 8, 128>}]} {
    %c0 = arith.constant 0 : index
    %c0_0 = arith.constant 0 : index
    %0 = vector.load %arg1[%c0, %c0_0] : memref<8x128xf32, #tpu.memory_space<vmem>>, vector<8x128xf32>
    %c0_1 = arith.constant 0 : index
    %c0_2 = arith.constant 0 : index
    %1 = vector.load %arg2[%c0_1, %c0_2] : memref<8x128xf32, #tpu.memory_space<vmem>>, vector<8x128xf32>
    %c0_3 = arith.constant 0 : index
    %c0_4 = arith.constant 0 : index
    %c0_5 = arith.constant 0 : index
    %2 = vector.load %arg3[%c0_3, %c0_4, %c0_5] : memref<3x128x128xf32, #tpu.memory_space<vmem>>, vector<1x128x128xf32>
    %3 = vector.shape_cast %2 : vector<1x128x128xf32> to vector<128x128xf32>
    %cst = arith.constant dense<0.000000e+00> : vector<8x128xf32>
    %4 = tpu.matmul %0, %3, %cst {dimension_numbers = #tpu.dot_dimension_numbers<[1], [0], [0], [1], [0, 0, 1, 1], [], []>} : vector<8x128xf32>, vector<128x128xf32>, vector<8x128xf32> -> vector<8x128xf32>
    %c0_6 = arith.constant 0 : index
    %c0_7 = arith.constant 0 : index
    %c0_8 = arith.constant 0 : index
    %5 = vector.load %arg4[%c0_6, %c0_7, %c0_8] : memref<3x1x128xf32, #tpu.memory_space<vmem>>, vector<1x1x128xf32>
    %6 = vector.shape_cast %5 : vector<1x1x128xf32> to vector<1x128xf32>
    %7 = vector.broadcast %6 : vector<1x128xf32> to vector<8x128xf32>
    %8 = arith.addf %4, %7 : vector<8x128xf32>
    %cst_9 = arith.constant 0.000000e+00 : f32
    %9 = vector.broadcast %cst_9 : f32 to vector<8x128xf32>
    %10 = arith.maximumf %8, %9 : vector<8x128xf32>
    %c1 = arith.constant 1 : index
    %c0_10 = arith.constant 0 : index
    %c0_11 = arith.constant 0 : index
    %11 = vector.load %arg3[%c1, %c0_10, %c0_11] : memref<3x128x128xf32, #tpu.memory_space<vmem>>, vector<1x128x128xf32>
    %12 = vector.shape_cast %11 : vector<1x128x128xf32> to vector<128x128xf32>
    %cst_12 = arith.constant dense<0.000000e+00> : vector<8x128xf32>
    %13 = tpu.matmul %10, %12, %cst_12 {dimension_numbers = #tpu.dot_dimension_numbers<[1], [0], [0], [1], [0, 0, 1, 1], [], []>} : vector<8x128xf32>, vector<128x128xf32>, vector<8x128xf32> -> vector<8x128xf32>
    %c1_13 = arith.constant 1 : index
    %c0_14 = arith.constant 0 : index
    %c0_15 = arith.constant 0 : index
    %14 = vector.load %arg4[%c1_13, %c0_14, %c0_15] : memref<3x1x128xf32, #tpu.memory_space<vmem>>, vector<1x1x128xf32>
    %15 = vector.shape_cast %14 : vector<1x1x128xf32> to vector<1x128xf32>
    %16 = vector.broadcast %15 : vector<1x128xf32> to vector<8x128xf32>
    %17 = arith.addf %13, %16 : vector<8x128xf32>
    %cst_16 = arith.constant 0.000000e+00 : f32
    %18 = vector.broadcast %cst_16 : f32 to vector<8x128xf32>
    %19 = arith.maximumf %17, %18 : vector<8x128xf32>
    %c2 = arith.constant 2 : index
    %c0_17 = arith.constant 0 : index
    %c0_18 = arith.constant 0 : index
    %20 = vector.load %arg3[%c2, %c0_17, %c0_18] : memref<3x128x128xf32, #tpu.memory_space<vmem>>, vector<1x128x128xf32>
    %21 = vector.shape_cast %20 : vector<1x128x128xf32> to vector<128x128xf32>
    %cst_19 = arith.constant dense<0.000000e+00> : vector<8x128xf32>
    %22 = tpu.matmul %19, %21, %cst_19 {dimension_numbers = #tpu.dot_dimension_numbers<[1], [0], [0], [1], [0, 0, 1, 1], [], []>} : vector<8x128xf32>, vector<128x128xf32>, vector<8x128xf32> -> vector<8x128xf32>
    %c2_20 = arith.constant 2 : index
    %c0_21 = arith.constant 0 : index
    %c0_22 = arith.constant 0 : index
    %23 = vector.load %arg4[%c2_20, %c0_21, %c0_22] : memref<3x1x128xf32, #tpu.memory_space<vmem>>, vector<1x1x128xf32>
    %24 = vector.shape_cast %23 : vector<1x1x128xf32> to vector<1x128xf32>
    %25 = vector.broadcast %24 : vector<1x128xf32> to vector<8x128xf32>
    %26 = arith.addf %22, %25 : vector<8x128xf32>
    %c120_i32 = arith.constant 120 : i32
    %27 = tpu.dynamic_rotate %26 by %c120_i32 dim 1 : vector<8x128xf32>, i32 -> vector<8x128xf32>
    %cst_23 = arith.constant -2.000000e+01 : f32
    %cst_24 = arith.constant 2.000000e+00 : f32
    %28 = vector.broadcast %cst_23 : f32 to vector<8x128xf32>
    %29 = arith.maximumf %28, %27 : vector<8x128xf32>
    %30 = vector.broadcast %cst_24 : f32 to vector<8x128xf32>
    %31 = arith.minimumf %30, %29 : vector<8x128xf32>
    %32 = math.exp %31 : vector<8x128xf32>
    %33 = arith.mulf %32, %1 : vector<8x128xf32>
    %34 = arith.addf %26, %33 : vector<8x128xf32>
    %cst_25 = arith.constant -5.000000e-01 : f32
    %35 = vector.broadcast %cst_25 : f32 to vector<8x128xf32>
    %36 = arith.mulf %35, %1 : vector<8x128xf32>
    %37 = arith.mulf %36, %1 : vector<8x128xf32>
    %38 = arith.subf %37, %31 : vector<8x128xf32>
    %cst_26 = arith.constant 0.918938517 : f32
    %39 = vector.broadcast %cst_26 : f32 to vector<8x128xf32>
    %40 = arith.subf %38, %39 : vector<8x128xf32>
    %cst_27 = arith.constant -2.000000e+00 : f32
    %41 = vector.broadcast %cst_27 : f32 to vector<8x128xf32>
    %42 = arith.mulf %41, %34 : vector<8x128xf32>
    %cst_28 = arith.constant 0.000000e+00 : f32
    %43 = vector.broadcast %cst_28 : f32 to vector<8x128xf32>
    %44 = arith.maximumf %42, %43 : vector<8x128xf32>
    %45 = math.absf %42 : vector<8x128xf32>
    %cst_29 = arith.constant 0.000000e+00 : f32
    %46 = vector.broadcast %cst_29 : f32 to vector<8x128xf32>
    %47 = arith.subf %46, %45 : vector<8x128xf32>
    %48 = math.exp %47 : vector<8x128xf32>
    %49 = math.log1p %48 : vector<8x128xf32>
    %50 = arith.addf %44, %49 : vector<8x128xf32>
    %cst_30 = arith.constant 0.693147182 : f32
    %51 = vector.broadcast %cst_30 : f32 to vector<8x128xf32>
    %52 = arith.subf %51, %34 : vector<8x128xf32>
    %53 = arith.subf %52, %50 : vector<8x128xf32>
    %cst_31 = arith.constant 2.000000e+00 : f32
    %54 = vector.broadcast %cst_31 : f32 to vector<8x128xf32>
    %55 = arith.mulf %54, %53 : vector<8x128xf32>
    %56 = tpu.iota {dimensions = array<i32: 1>} : vector<8x128xi32>
    %c8_i32 = arith.constant 8 : i32
    %57 = vector.broadcast %c8_i32 : i32 to vector<8x128xi32>
    %58 = arith.cmpi slt, %56, %57 : vector<8x128xi32>
    %59 = arith.subf %40, %55 : vector<8x128xf32>
    %cst_32 = arith.constant 0.000000e+00 : f32
    %60 = vector.broadcast %cst_32 : f32 to vector<8x128xf32>
    %61 = arith.select %58, %59, %60 : vector<8x128xi1>, vector<8x128xf32>
    %cst_33 = arith.constant dense<0.000000e+00> : vector<8xf32>
    %62 = vector.multi_reduction <add>, %61, %cst_33 [1] : vector<8x128xf32> to vector<8xf32>
    %63 = vector.shape_cast %62 : vector<8xf32> to vector<8x1xf32>
    %64 = math.tanh %34 : vector<8x128xf32>
    %cst_34 = arith.constant 1.000000e+00 : f32
    %65 = vector.broadcast %cst_34 : f32 to vector<8x128xf32>
    %66 = arith.mulf %65, %64 : vector<8x128xf32>
    %cst_35 = arith.constant 0.000000e+00 : f32
    %67 = vector.broadcast %cst_35 : f32 to vector<8x128xf32>
    %68 = arith.select %58, %66, %67 : vector<8x128xi1>, vector<8x128xf32>
    %c8_i32_36 = arith.constant 8 : i32
    %69 = vector.broadcast %c8_i32_36 : i32 to vector<8x128xi32>
    %70 = arith.cmpi eq, %56, %69 : vector<8x128xi32>
    %71 = vector.shape_cast %63 : vector<8x1xf32> to vector<8x1xf32>
    %72 = vector.broadcast %71 : vector<8x1xf32> to vector<8x128xf32>
    %73 = arith.select %70, %72, %68 : vector<8x128xi1>, vector<8x128xf32>
    %c0_37 = arith.constant 0 : index
    %c0_38 = arith.constant 0 : index
    %74 = vector.load %arg5[%c0_37, %c0_38] : memref<8x128xf32, #tpu.memory_space<vmem>>, vector<8x128xf32>
    tpu.vector_store %arg5[%c0_37, %c0_38], %73 {strides = array<i32>} : memref<8x128xf32, #tpu.memory_space<vmem>>, vector<8x128xf32>,
    return
  }
  func.func @transform_0(%arg0: i32) -> (i32, i32) {
    %c0_i32 = arith.constant 0 : i32
    %c0_i32_0 = arith.constant 0 : i32
    return %arg0, %c0_i32 : i32, i32
  }
  func.func @transform_1(%arg0: i32) -> (i32, i32) {
    %c0_i32 = arith.constant 0 : i32
    %c0_i32_0 = arith.constant 0 : i32
    return %arg0, %c0_i32 : i32, i32
  }
  func.func @transform_2(%arg0: i32) -> (i32, i32, i32) {
    %c0_i32 = arith.constant 0 : i32
    %c0_i32_0 = arith.constant 0 : i32
    %c0_i32_1 = arith.constant 0 : i32
    %c0_i32_2 = arith.constant 0 : i32
    return %c0_i32, %c0_i32_0, %c0_i32_1 : i32, i32, i32
  }
  func.func @transform_3(%arg0: i32) -> (i32, i32, i32) {
    %c0_i32 = arith.constant 0 : i32
    %c0_i32_0 = arith.constant 0 : i32
    %c0_i32_1 = arith.constant 0 : i32
    %c0_i32_2 = arith.constant 0 : i32
    return %c0_i32, %c0_i32_0, %c0_i32_1 : i32, i32, i32
  }
  func.func @transform_4(%arg0: i32) -> (i32, i32) {
    %c0_i32 = arith.constant 0 : i32
    %c0_i32_0 = arith.constant 0 : i32
    return %arg0, %c0_i32 : i32, i32
  }
}

</mosaic_0001>

<bundles_post_ra>
// kernel: tpu_custom_call.1
= control target key start
LH: loop header
LB: loop body
LE: loop exit
PB: predicated region body
PF: predicated region fallthrough
CT: control target
= control target key end

     0   :  { %9 = vsyncpa [#allocation3], 0  ;;  %s777_s0 = inlined_call_operand.hbm [shape: f32[8,128], index: 0, kind: input, shape index: {}]   ;;  %s778_s1 = inlined_call_operand.hbm [shape: f32[8,128], index: 1, kind: input, shape index: {}]   ;;  %s779_s2 = inlined_call_operand.hbm [shape: f32[3,128,128], index: 2, kind: input, shape index: {}]   ;;  %s780_s3 = inlined_call_operand.vmem [shape: f32[3,1,128], index: 3, kind: input, shape index: {}]   ;;  %s781_s4 = inlined_call_operand.hbm [shape: f32[8,128], index: 4, kind: output, shape index: {}]  }
   0x1   :  { %10 = vsyncpa [#allocation6], 0 }
   0x2   :  { %11 = vsyncpa [#allocation4], 0  ;;  %s666_s15 = smov [#allocation5]   ;;  %s667_s17 = smov [#allocation2]  }
   0x3   :  { %s28_s16 = sshll.u32 %s666_s15, 4  ;;  %s18_s18 = sshll.u32 %s667_s17, 4  ;;  %s29_s16 = int_to_ptr.vmem [resolvable:$true] %s28_s16  ;;  %s19_s18 = int_to_ptr.vmem [resolvable:$true] %s18_s18 }
   0x4   :  { %s588_s19 = scalar_lea.vmem %s29_s16, 128  ;;  %p593_p1 = scmp.lt.s32.totalorder %s29_s16, %s29_s16 }
   0x5   :  { %p589_p0 = scmp.ne.s32.totalorder %s29_s16, %s588_s19  ;;  %p594_p2 = scmp.lt.s32.totalorder %s588_s19, %s588_s19 }
   0x7   :  { %p595_p3 = por %p594_p2, %p593_p1 }
   0x9   :  { %p596_p4 = pnand %p595_p3, %p589_p0 }
   0xb   :  { %599 = shalt.err (!%p596_p4)
}
   0xc   :  { %31 = dma.hbm_to_vmem [thread:$0]  %s778_s1, 128, %s29_s16, [#allocation6]  }
   0xd   :  { %s608_s22 = scalar_lea.vmem %s19_s18, 128  ;;  %p613_p6 = scmp.lt.s32.totalorder %s19_s18, %s19_s18 }
   0xe   :  { %p609_p5 = scmp.ne.s32.totalorder %s19_s18, %s608_s22  ;;  %p614_p7 = scmp.lt.s32.totalorder %s608_s22, %s608_s22 }
  0x10   :  { %p615_p8 = por %p614_p7, %p613_p6 }
  0x12   :  { %p616_p9 = pnand %p615_p8, %p609_p5 }
  0x14   :  { %619 = shalt.err (!%p616_p9)
}
  0x15   :  { %21 = dma.hbm_to_vmem [thread:$0]  %s777_s0, 128, %s19_s18, [#allocation3]  }
  0x16   :  { %s668_s25 = smov [#allocation7]  }
  0x17   :  { %s37_s26 = sshll.u32 %s668_s25, 4  ;;  %s38_s26 = int_to_ptr.vmem [resolvable:$true] %s37_s26 }
  0x18   :  { %s628_s27 = scalar_lea.vmem %s38_s26, 6144  ;;  %p633_p11 = scmp.lt.s32.totalorder %s38_s26, %s38_s26 }
  0x19   :  { %p629_p10 = scmp.ne.s32.totalorder %s38_s26, %s628_s27  ;;  %p634_p12 = scmp.lt.s32.totalorder %s628_s27, %s628_s27 }
  0x1b   :  { %p635_p13 = por %p634_p12, %p633_p11 }
  0x1d   :  { %p636_p0 = pnand %p635_p13, %p629_p10 }
  0x1f   :  { %639 = shalt.err (!%p636_p0)
}
  0x20   :  { %s669_s1 = smov 128   ;;  %s670_s28 = smov 8  }
  0x21   :  { %43 = dma.hbm_to_vmem [thread:$0]  %s779_s2, 6144, %s38_s26, [#allocation6], %s669_s1, %s669_s1, %s670_s28  }
  0x22   :  { %660 = dma.done.wait [#allocation3], 128  }
  0x23   :  { %661 = vsyncadd [#allocation3], 4294967168 }
  0x24   :  { %662 = dma.done.wait [#allocation6], 6272  }
  0x25   :  { %663 = vsyncadd [#allocation6], 4294961024  ;;  %v671_v0 = vmov 0.0   ;;  %vm672_vm0 = vmmov 0   ;;  %v72_v1 = vld [vmem:[#allocation7 + $0x78] sm:$0xff]  ;;  %v71_v2 = vld [vmem:[#allocation7 + $0x70] sm:$0xff] }
  0x26   :  { %458 = vmatprep.subr.mxu0 %v671_v0  ;;  %490 = vmatprep.mubr.msk.f32.mxu0 %vm672_vm0, %v671_v0  ;;  %v70_v3 = vld [vmem:[#allocation7 + $0x68] sm:$0xff]  ;;  %v69_v4 = vld [vmem:[#allocation7 + $0x60] sm:$0xff]  ;;  %v167_v5 = vld [vmem:[#allocation7 + $0xf8] sm:$0xff]  ;;  %s673_s9 = smov 120  }
  0x27   :  { %493 = vmatprep.subr.mxu1 %v671_v0  ;;  %525 = vmatprep.mubr.msk.f32.mxu1 %vm672_vm0, %v671_v0  ;;  %v68_v6 = vld [vmem:[#allocation7 + $0x58] sm:$0xff]  ;;  %v166_v7 = vld [vmem:[#allocation7 + $0xf0] sm:$0xff]  ;;  %v165_v8 = vld [vmem:[#allocation7 + $0xe8] sm:$0xff] }
  0x28   :  { %459 = vmatpush3.msra.mxu0 %v72_v1  ;;  %494 = vmatpush3.msra.mxu1 %v167_v5  ;;  %v67_v9 = vld [vmem:[#allocation7 + $0x50] sm:$0xff]  ;;  %v164_v10 = vld [vmem:[#allocation7 + $0xe0] sm:$0xff]  ;;  %v66_v11 = vld [vmem:[#allocation7 + $0x48] sm:$0xff] }
  0x29   :  { %460 = vmatprep.subr.mxu0 %v671_v0  ;;  %495 = vmatprep.subr.mxu1 %v671_v0  ;;  %v163_v12 = vld [vmem:[#allocation7 + $0xd8] sm:$0xff]  ;;  %v65_v13 = vld [vmem:[#allocation7 + $0x40] sm:$0xff]  ;;  %v162_v14 = vld [vmem:[#allocation7 + $0xd0] sm:$0xff] }
  0x2a   :  { %461 = vmatpush3.msra.mxu0 %v71_v2  ;;  %496 = vmatpush3.msra.mxu1 %v166_v7  ;;  %v64_v15 = vld [vmem:[#allocation7 + $0x38] sm:$0xff]  ;;  %v161_v16 = vld [vmem:[#allocation7 + $0xc8] sm:$0xff]  ;;  %v63_v17 = vld [vmem:[#allocation7 + $0x30] sm:$0xff] }
  0x2b   :  { %462 = vmatprep.subr.mxu0 %v671_v0  ;;  %497 = vmatprep.subr.mxu1 %v671_v0  ;;  %v160_v18 = vld [vmem:[#allocation7 + $0xc0] sm:$0xff]  ;;  %v62_v19 = vld [vmem:[#allocation7 + $0x28] sm:$0xff]  ;;  %v159_v20 = vld [vmem:[#allocation7 + $0xb8] sm:$0xff] }
  0x2c   :  { %463 = vmatpush3.msra.mxu0 %v70_v3  ;;  %498 = vmatpush3.msra.mxu1 %v165_v8  ;;  %v61_v21 = vld [vmem:[#allocation7 + $0x20] sm:$0xff]  ;;  %v158_v22 = vld [vmem:[#allocation7 + $0xb0] sm:$0xff]  ;;  %v60_v23 = vld [vmem:[#allocation7 + $0x18] sm:$0xff] }
  0x2d   :  { %464 = vmatprep.subr.mxu0 %v671_v0  ;;  %499 = vmatprep.subr.mxu1 %v671_v0  ;;  %v157_v24 = vld [vmem:[#allocation7 + $0xa8] sm:$0xff]  ;;  %v59_v25 = vld [vmem:[#allocation7 + $0x10] sm:$0xff]  ;;  %v156_v26 = vld [vmem:[#allocation7 + $0xa0] sm:$0xff] }
  0x2e   :  { %465 = vmatpush3.msra.mxu0 %v69_v4  ;;  %500 = vmatpush3.msra.mxu1 %v164_v10  ;;  %v58_v27 = vld [vmem:[#allocation7 + $0x8] sm:$0xff]  ;;  %v155_v28 = vld [vmem:[#allocation7 + $0x98] sm:$0xff]  ;;  %v57_v29 = vld [vmem:[#allocation7] sm:$0xff]  ;;  %v373_v10 = vlaneseq }
  0x2f   :  { %466 = vmatprep.subr.mxu0 %v671_v0  ;;  %501 = vmatprep.subr.mxu1 %v671_v0  ;;  %v55_v30 = vld [vmem:[#allocation2] sm:$0xff]  ;;  %v153_v32 = vld [vmem:[#allocation7 + $0x88] sm:$0xff]  ;;  %v152_v33 = vld [vmem:[#allocation7 + $0x80] sm:$0xff] }
  0x30   :  { %467 = vmatpush3.msra.mxu0 %v68_v6  ;;  %502 = vmatpush3.msra.mxu1 %v163_v12  ;;  %v154_v31 = vld [vmem:[#allocation7 + $0x90] sm:$0xff]  ;;  %v263_v34 = vld [vmem:[#allocation7 + $0x178] sm:$0xff]  ;;  %v261_v36 = vld [vmem:[#allocation7 + $0x168] sm:$0xff] }
  0x31   :  { %468 = vmatprep.subr.mxu0 %v671_v0  ;;  %503 = vmatprep.subr.mxu1 %v671_v0  ;;  %v262_v35 = vld [vmem:[#allocation7 + $0x170] sm:$0xff]  ;;  %v260_v37 = vld [vmem:[#allocation7 + $0x160] sm:$0xff]  ;;  %v259_v38 = vld [vmem:[#allocation7 + $0x158] sm:$0xff] }
  0x32   :  { %469 = vmatpush3.msra.mxu0 %v67_v9  ;;  %504 = vmatpush3.msra.mxu1 %v162_v14  ;;  %v258_v39 = vld [vmem:[#allocation7 + $0x150] sm:$0xff]  ;;  %v257_v40 = vld [vmem:[#allocation7 + $0x148] sm:$0xff]  ;;  %v256_v41 = vld [vmem:[#allocation7 + $0x140] sm:$0xff] }
  0x33   :  { %470 = vmatprep.subr.mxu0 %v671_v0  ;;  %505 = vmatprep.subr.mxu1 %v671_v0  ;;  %v255_v42 = vld [vmem:[#allocation7 + $0x138] sm:$0xff]  ;;  %v254_v43 = vld [vmem:[#allocation7 + $0x130] sm:$0xff]  ;;  %v253_v44 = vld [vmem:[#allocation7 + $0x128] sm:$0xff] }
  0x34   :  { %471 = vmatpush3.msra.mxu0 %v66_v11  ;;  %506 = vmatpush3.msra.mxu1 %v161_v16  ;;  %v252_v45 = vld [vmem:[#allocation7 + $0x120] sm:$0xff]  ;;  %v251_v46 = vld [vmem:[#allocation7 + $0x118] sm:$0xff]  ;;  %v401_v47 = vld [vmem:[%s780_s3] ss:$0 sm:$0xff] }
  0x35   :  { %472 = vmatprep.subr.mxu0 %v671_v0  ;;  %507 = vmatprep.subr.mxu1 %v671_v0  ;;  %v250_v52 = vld [vmem:[#allocation7 + $0x110] sm:$0xff]  ;;  %v249_v53 = vld [vmem:[#allocation7 + $0x108] sm:$0xff]  ;;  %v248_v54 = vld [vmem:[#allocation7 + $0x100] sm:$0xff] }
  0x36   :  { %473 = vmatpush3.msra.mxu0 %v65_v13  ;;  %508 = vmatpush3.msra.mxu1 %v160_v18  ;;  %v403_v55 = vld [vmem:[%s780_s3 + $0x1] ss:$0 sm:$0xff]  ;;  %v405_v60 = vld [vmem:[%s780_s3 + $0x2] ss:$0 sm:$0xff]  ;;  %v56_v5 = vld [vmem:[#allocation5] sm:$0xff]  ;;  %v374_v13 = vand.u32 127, %v373_v10 }
  0x37   :  { %474 = vmatprep.subr.mxu0 %v671_v0  ;;  %509 = vmatprep.subr.mxu1 %v671_v0  ;;  %s674_s3 = smov [#allocation8]  }
  0x38   :  { %475 = vmatpush3.msra.mxu0 %v64_v15  ;;  %510 = vmatpush3.msra.mxu1 %v159_v20  ;;  %vm375_vm1 = vcmp.lt.s32.totalorder %v374_v13, 8  ;;  %s391_s10 = sshll.u32 %s674_s3, 4  ;;  %vm382_vm3 = vcmp.eq.s32.totalorder %v374_v13, 8  ;;  %s392_s10 = int_to_ptr.vmem [resolvable:$true] %s391_s10 }
  0x39   :  { %476 = vmatprep.subr.mxu0 %v671_v0  ;;  %511 = vmatprep.subr.mxu1 %v671_v0  ;;  %s640_s11 = scalar_lea.vmem %s392_s10, 128  ;;  %p645_p2 = scmp.lt.s32.totalorder %s392_s10, %s392_s10 }
  0x3a   :  { %477 = vmatpush3.msra.mxu0 %v63_v17  ;;  %512 = vmatpush3.msra.mxu1 %v158_v22  ;;  %p641_p1 = scmp.ne.s32.totalorder %s392_s10, %s640_s11  ;;  %p646_p3 = scmp.lt.s32.totalorder %s640_s11, %s640_s11 }
  0x3b   :  { %478 = vmatprep.subr.mxu0 %v671_v0  ;;  %513 = vmatprep.subr.mxu1 %v671_v0 }
  0x3c   :  { %479 = vmatpush3.msra.mxu0 %v62_v19  ;;  %514 = vmatpush3.msra.mxu1 %v157_v24  ;;  %v350_v19 = vmul.f32 -0.5, %v56_v5  ;;  %p647_p4 = por %p646_p3, %p645_p2 }
  0x3d   :  { %480 = vmatprep.subr.mxu0 %v671_v0  ;;  %515 = vmatprep.subr.mxu1 %v671_v0 }
  0x3e   :  { %481 = vmatpush3.msra.mxu0 %v61_v21  ;;  %516 = vmatpush3.msra.mxu1 %v156_v26  ;;  %p648_p5 = pnand %p647_p4, %p641_p1 }
  0x3f   :  { %482 = vmatprep.subr.mxu0 %v671_v0  ;;  %517 = vmatprep.subr.mxu1 %v671_v0 }
  0x40   :  { %483 = vmatpush3.msra.mxu0 %v60_v23  ;;  %518 = vmatpush3.msra.mxu1 %v155_v28  ;;  %v351_v23 = vmul.f32 %v350_v19, %v56_v5 }
  0x41   :  { %484 = vmatprep.subr.mxu0 %v671_v0  ;;  %519 = vmatprep.subr.mxu1 %v671_v0 }
  0x42   :  { %485 = vmatpush3.msra.mxu0 %v59_v25  ;;  %520 = vmatpush3.msra.mxu1 %v154_v31 }
  0x43   :  { %486 = vmatprep.subr.mxu0 %v671_v0  ;;  %521 = vmatprep.subr.mxu1 %v671_v0 }
  0x44   :  { %487 = vmatpush3.msra.mxu0 %v58_v27  ;;  %522 = vmatpush3.msra.mxu1 %v153_v32 }
  0x45   :  { %488 = vmatprep.subr.mxu0 %v671_v0  ;;  %523 = vmatprep.subr.mxu1 %v671_v0 }
  0x46   :  { %489 = vmatpush3.msra.mxu0 %v57_v29  ;;  %524 = vmatpush3.msra.mxu1 %v152_v33 }
  0x47   :  { %491 = vmatmul.mubr.f32.vlgmr.msra.gmra.mxu0 %v55_v30  ;;  %528 = vmatprep.subr.mxu0 %v671_v0 }
  0x48   :  { %560 = vmatprep.mubr.msk.f32.mxu0 %vm672_vm0, %v671_v0  ;;  %529 = vmatpush3.msra.mxu0 %v263_v34 }
  0x49   :  { %530 = vmatprep.subr.mxu0 %v671_v0 }
  0x4a   :  { %531 = vmatpush3.msra.mxu0 %v262_v35 }
  0x4b   :  { %532 = vmatprep.subr.mxu0 %v671_v0 }
  0x4c   :  { %533 = vmatpush3.msra.mxu0 %v261_v36 }
  0x4d   :  { %534 = vmatprep.subr.mxu0 %v671_v0 }
  0x4e   :  { %535 = vmatpush3.msra.mxu0 %v260_v37 }
  0x4f   :  { %536 = vmatprep.subr.mxu0 %v671_v0 }
  0x50   :  { %537 = vmatpush3.msra.mxu0 %v259_v38 }
  0x51   :  { %538 = vmatprep.subr.mxu0 %v671_v0 }
  0x52   :  { %539 = vmatpush3.msra.mxu0 %v258_v39 }
  0x53   :  { %540 = vmatprep.subr.mxu0 %v671_v0 }
  0x54   :  { %541 = vmatpush3.msra.mxu0 %v257_v40 }
  0x55   :  { %542 = vmatprep.subr.mxu0 %v671_v0 }
  0x56   :  { %543 = vmatpush3.msra.mxu0 %v256_v41 }
  0x57   :  { %544 = vmatprep.subr.mxu0 %v671_v0 }
  0x58   :  { %545 = vmatpush3.msra.mxu0 %v255_v42 }
  0x59   :  { %546 = vmatprep.subr.mxu0 %v671_v0 }
  0x5a   :  { %547 = vmatpush3.msra.mxu0 %v254_v43 }
  0x5b   :  { %548 = vmatprep.subr.mxu0 %v671_v0 }
  0x5c   :  { %549 = vmatpush3.msra.mxu0 %v253_v44 }
  0x5d   :  { %550 = vmatprep.subr.mxu0 %v671_v0 }
  0x5e   :  { %551 = vmatpush3.msra.mxu0 %v252_v45 }
  0x5f   :  { %552 = vmatprep.subr.mxu0 %v671_v0 }
  0x60   :  { %553 = vmatpush3.msra.mxu0 %v251_v46 }
  0x61   :  { %554 = vmatprep.subr.mxu0 %v671_v0 }
  0x62   :  { %555 = vmatpush3.msra.mxu0 %v250_v52 }
  0x63   :  { %556 = vmatprep.subr.mxu0 %v671_v0 }
  0x64   :  { %557 = vmatpush3.msra.mxu0 %v249_v53 }
  0x65   :  { %558 = vmatprep.subr.mxu0 %v671_v0 }
  0x66   :  { %559 = vmatpush3.msra.mxu0 %v248_v54 }
 0x107   :  { %v146_v48 = vpop.f32.mrf.mxu0 }
 0x108   :  { %v147_v49 = vadd.f32 %v401_v47, %v146_v48 }
 0x109   :  { %v492_v50 = vpop.f32.mrf.mxu0 }
 0x10a   :  { %v150_v51 = vmax.f32 %v147_v49, 0.0 }
 0x10c   :  { %526 = vmatmul.mubr.f32.vlgmr.msra.gmra.mxu1 %v150_v51 }
 0x1cc   :  { %v242_v56 = vpop.f32.mrf.mxu1 }
 0x1cd   :  { %v243_v57 = vadd.f32 %v403_v55, %v242_v56 }
 0x1ce   :  { %v527_v58 = vpop.f32.mrf.mxu1 }
 0x1cf   :  { %v246_v59 = vmax.f32 %v243_v57, 0.0 }
 0x1d1   :  { %561 = vmatmul.mubr.f32.vlgmr.msra.gmra.mxu0 %v246_v59 }
 0x291   :  { %v338_v61 = vpop.f32.mrf.mxu0 }
 0x292   :  { %v339_v62 = vadd.f32 %v405_v60, %v338_v61 }
 0x293   :  { %v562_v63 = vpop.f32.mrf.mxu0 }
 0x294   :  { %342 = vrot.lane.b32.xlu0 %v339_v62, %s673_s9 }
 0x306   :  { %v343_v0 = vpop.permute.xlu0 %342 }
 0x307   :  { %v344_v1 = vmax.f32 %v343_v0, -20.0 }
 0x309   :  { %v345_v2 = vmin.f32 %v344_v1, 2.0 }
 0x30b   :  { %v346_v3 = vmul.f32 1.442695, %v345_v2  ;;  %v352_v28 = vsub.f32 %v351_v23, %v345_v2 }
 0x30d   :  { %572 = vpow2.f32 %v346_v3  ;;  %v406_v32 = vadd.f32 -0.9189385, %v352_v28 }
 0x31a   :  { %v573_v4 = vpop.eup %572 }
 0x31b   :  { %v348_v6 = vmul.f32 %v573_v4, %v56_v5 }
 0x31d   :  { %v349_v7 = vadd.f32 %v348_v6, %v339_v62 }
 0x31f   :  { %v354_v8 = vmul.f32 -2.0, %v349_v7  ;;  %574 = vtanh.f32 %v349_v7  ;;  %v370_v30 = vsub.f32 0.6931472, %v349_v7 }
 0x321   :  { %v356_v9 = vand.u32 2147483647, %v354_v8  ;;  %v355_v26 = vmax.f32 %v354_v8, 0.0 }
 0x323   :  { %v357_v11 = vsub.f32 0.0, %v356_v9 }
 0x325   :  { %v358_v12 = vmul.f32 1.442695, %v357_v11 }
 0x327   :  { %576 = vpow2.f32 %v358_v12 }
 0x32c   :  { %v575_v14 = vpop.eup %574 }
 0x32d   :  { %v381_v15 = vsel %vm375_vm1, %v575_v14, 0.0 }
 0x334   :  { %v577_v16 = vpop.eup %576 }
 0x335   :  { %v360_v17 = vadd.f32 1.0, %v577_v16  ;;  %v363_v18 = vmul.f32 -0.5, %v577_v16  ;;  %v366_v21 = vand.u32 2147483647, %v577_v16 }
 0x337   :  { %578 = vlog2.f32 %v360_v17  ;;  %v364_v20 = vadd.f32 1.0, %v363_v18  ;;  %vm367_vm2 = vcmp.lt.f32.partialorder %v366_v21, 0.0004427343 }
 0x339   :  { %v365_v25 = vmul.f32 %v577_v16, %v364_v20 }
 0x344   :  { %v579_v22 = vpop.eup %578 }
 0x345   :  { %v362_v24 = vmul.f32 0.6931472, %v579_v22 }
 0x347   :  { %v368_v27 = vsel %vm367_vm2, %v365_v25, %v362_v24 }
 0x348   :  { %v369_v29 = vadd.f32 %v368_v27, %v355_v26 }
 0x34a   :  { %v371_v31 = vsub.f32 %v370_v30, %v369_v29 }
 0x34c   :  { %v372_v33 = vmul.f32 2.0, %v371_v31 }
 0x34e   :  { %v376_v34 = vsub.f32 %v406_v32, %v372_v33 }
 0x350   :  { %v377_v35 = vsel %vm375_vm1, %v376_v34, 0.0 }
 0x351   :  { %378 = vadd.xlane.f32.xlu0 %v377_v35 }
 0x3da   :  { %v379_v36 = vpop.xlane.xlu0 %378 }
 0x3db   :  { %v383_v37 = vsel %vm382_vm3, %v379_v36, %v381_v15 }
 0x3dc   :  { %384 = vst [vmem:[#allocation8] sm:$0xff] %v383_v37 }
 0x3dd   :  { %651 = shalt.err (!%p648_p5)
}
 0x3de   :  { %394 = dma.vmem_to_hbm [thread:$0]  %s392_s10, 128, %s781_s4, [#allocation4]  }
 0x3df   :  { %664 = dma.done.wait [#allocation4], 128  }
 0x3e0   :  { %665 = vsyncadd [#allocation4], 4294967168 }
 0x3e1   :  { %398 = vsyncpa [#allocation3], 1 }
 0x3e2   :  { %399 = vsyncpa [#allocation6], 1 }
 0x3e3   :  { %400 = vsyncpa [#allocation4], 1 }

</bundles_post_ra>
